<compile_context>
chip_gen: v5e
topology: v5e:2x2
jax: 0.10.0
libtpu: 0.0.40
codegen_flags: <defaults>
</compile_context>

<pallas_src>
import numpy as np
import jax
import jax.numpy as jnp
from jax.experimental import pallas as pl
from jax.experimental.pallas import tpu as pltpu

_LANE = 128
_ROW_CHUNK = 32      # rows folded per register partial (lane-packed path)
_LANE_CHUNK = 1024   # lanes folded per register partial (ragged-S fallback path)
_MAX_CHUNKS = 64     # bounds the unrolled fold loop / trace size


def _make_kernel(C, sp_block, chunk, pos_bound, mask_tail, dense_gt):
    """SS partial-sum kernel.  Grid = (B, num_spatial_tiles).

    sp_block: spatial shape of one tile, (TR, 128) lane-packed or (TS,) fallback.
    chunk:    fold width along sp_block[0] (divides sp_block[0]).
    pos_bound: number of valid positions along sp_block[0] across the whole
               spatial axis (G for lane-packed, S for fallback).
    """
    ext = int(sp_block[0])
    ng = ext // int(chunk)
    tile_shape = (C,) + tuple(sp_block)

    def _col(v):
        # (C, ...) -> (C, 1) via minor-axis reductions only (epilogue, runs once).
        while v.ndim > 2:
            v = jnp.sum(v, axis=-1)
        return jnp.sum(v, axis=-1, keepdims=True)

    def kernel(g_ref, x_ref, o_se_ref, o_sey_ref, o_y_ref,
               acc_se, acc_sey, acc_y):
        s = pl.program_id(1)
        last = pl.num_programs(1) - 1

        @pl.when(s == 0)
        def _init():
            acc_se[...] = jnp.zeros_like(acc_se)
            acc_sey[...] = jnp.zeros_like(acc_sey)
            acc_y[...] = jnp.zeros_like(acc_y)

        def accumulate(masked):
            x = x_ref[0].astype(jnp.float32)                    # (C,) + sp_block
            if dense_gt:
                mf = g_ref[0].astype(jnp.float32)               # (C,) + sp_block
            else:
                ch_idx = jax.lax.broadcasted_iota(jnp.int32, tile_shape, 0)
                lab = g_ref[0].astype(jnp.int32)                # (1,) + sp_block
                mf = (lab == ch_idx).astype(jnp.float32)
            d = mf - x
            if masked:
                # Only traced into the last-tile branch: mask both d and mf so
                # garbage in the out-of-bounds region of the final block cannot
                # leak into any accumulated quantity.
                pos = jax.lax.broadcasted_iota(jnp.int32, tile_shape, 1)
                valid = (s * ext + pos) < pos_bound
                d = jnp.where(valid, d, 0.0)
                mf = jnp.where(valid, mf, 0.0)
            se = d * d
            sey = se * mf
            # Fold the tile down to accumulator width with pure VPU adds on
            # aligned, register-resident slices; a single RMW touches VMEM.
            p_se = p_sey = p_y = None
            for k in range(ng):
                sl = slice(k * chunk, (k + 1) * chunk)
                if k == 0:
                    p_se, p_sey, p_y = se[:, sl], sey[:, sl], mf[:, sl]
                else:
                    p_se = p_se + se[:, sl]
                    p_sey = p_sey + sey[:, sl]
                    p_y = p_y + mf[:, sl]
            acc_se[...] += p_se
            acc_sey[...] += p_sey
            acc_y[...] += p_y

        if mask_tail:
            @pl.when(s != last)
            def _main():
                accumulate(False)

            @pl.when(s == last)
            def _tail():
                accumulate(True)
        else:
            accumulate(False)

        @pl.when(s == last)
        def _fin():
            # Single cross-lane reduction per quantity, written once each.
            o_se_ref[0] = _col(acc_se[...])
            o_sey_ref[0] = _col(acc_sey[...])
            o_y_ref[0] = _col(acc_y[...])

    return kernel


def _ss_partial_sums(x, g, dense_gt, tile_bytes):
    """x: (B, C, S) any float dtype; g: (B, 1, S) int labels or (B, C, S) dense gt.
    Returns (sum_se, sum_se*y, sum_y), each (B, C) f32."""
    B, C, S = (int(d) for d in x.shape)
    Cg = int(g.shape[1])
    itemsize = int(x.dtype.itemsize)
    lane_packed = (S % _LANE == 0) and (S >= _LANE)

    if lane_packed:
        # Free row-major split: full 8-sublane vreg utilization even for small C.
        G = S // _LANE
        budget_rows = max(_ROW_CHUNK, tile_bytes // (C * _LANE * itemsize))
        budget_rows = min(budget_rows, _ROW_CHUNK * _MAX_CHUNKS)
        budget_rows = (budget_rows // _ROW_CHUNK) * _ROW_CHUNK
        TR = G if G <= budget_rows else budget_rows
        num_tiles = -(-G // TR)
        mask_tail = num_tiles * TR != G
        chunk = _ROW_CHUNK if TR % _ROW_CHUNK == 0 else TR
        sp_block = (TR, _LANE)
        pos_bound = G
        x_in = x.reshape(B, C, G, _LANE)
        g_in = g.reshape(B, Cg, G, _LANE)
        x_spec = pl.BlockSpec((1, C, TR, _LANE), lambda b, s: (b, 0, s, 0))
        g_spec = pl.BlockSpec((1, Cg, TR, _LANE), lambda b, s: (b, 0, s, 0))
    else:
        # Ragged-S fallback: lane-tiled (C, TS) blocks, no wrapper-side padding copy.
        budget_lanes = max(_LANE_CHUNK, tile_bytes // (C * itemsize))
        budget_lanes = min(budget_lanes, _LANE_CHUNK * _MAX_CHUNKS)
        budget_lanes = (budget_lanes // _LANE_CHUNK) * _LANE_CHUNK
        TS = S if S <= budget_lanes else budget_lanes
        num_tiles = -(-S // TS)
        mask_tail = num_tiles * TS != S
        chunk = _LANE_CHUNK if TS % _LANE_CHUNK == 0 else TS
        sp_block = (TS,)
        pos_bound = S
        x_in = x
        g_in = g
        x_spec = pl.BlockSpec((1, C, TS), lambda b, s: (b, 0, s))
        g_spec = pl.BlockSpec((1, Cg, TS), lambda b, s: (b, 0, s))

    kernel = _make_kernel(C, sp_block, chunk, pos_bound, mask_tail, dense_gt)

    acc_shape = (C,) + ((chunk, _LANE) if len(sp_block) == 2 else (chunk,))
    out_sds = jax.ShapeDtypeStruct((B, C, 1), jnp.float32)
    out_spec = pl.BlockSpec((1, C, 1), lambda b, s: (b, 0, 0))

    g_bytes = int(np.prod(g_in.shape)) * int(g_in.dtype.itemsize)
    cost = pl.CostEstimate(flops=8 * B * C * S, transcendentals=0,
                           bytes_accessed=x.size * itemsize + g_bytes + B * C * 3 * 4)

    # TODO(synk): when B == 1 on v7x, add an outer "parallel" spatial
    # super-block axis (and sum the per-super-block partials in the wrapper)
    # so the second TensorCore gets work.
    sums = pl.pallas_call(
        kernel,
        out_shape=(out_sds, out_sds, out_sds),
        grid_spec=pltpu.PrefetchScalarGridSpec(
            num_scalar_prefetch=0,
            grid=(B, num_tiles),
            in_specs=[g_spec, x_spec],
            out_specs=(out_spec, out_spec, out_spec),
            scratch_shapes=[pltpu.VMEM(acc_shape, jnp.float32)] * 3,
        ),
        compiler_params=pltpu.CompilerParams(
            dimension_semantics=("parallel", "arbitrary"),
            vmem_limit_bytes=32 * 1024 * 1024,
        ),
        cost_estimate=cost,
    )(g_in, x_in)
    sum_se, sum_sey, sum_y = (v[..., 0] for v in sums)
    return sum_se, sum_sey, sum_y


def ss_loss(net_output, gt, *, apply_nonlin=None, batch_dice=False, do_bg=True,
            smooth=1.0, r=0.1, square=False, tile_bytes=2 * 1024 * 1024):
    """JAX/Pallas equivalent of SSLoss.forward (the `square` flag is unused,
    exactly as in the reference PyTorch code)."""
    shp_x = tuple(int(d) for d in net_output.shape)
    B, C = shp_x[0], shp_x[1]
    S = int(np.prod(shp_x[2:])) if len(shp_x) > 2 else 1

    # ---- ground-truth handling (mirrors the torch.no_grad() block) ----
    if gt.ndim != net_output.ndim:
        gt = gt.reshape((gt.shape[0], 1) + tuple(gt.shape[1:]))
    dense_gt = tuple(int(d) for d in gt.shape) == shp_x

    if apply_nonlin is not None:
        net_output = apply_nonlin(net_output)

    x = net_output.reshape(B, C, S)           # native dtype streams through (bf16 stays bf16)
    if dense_gt:
        # gt already has the full (B, C, ...) shape: stream it and use the values
        # directly (handles hard one-hot AND soft labels, matching the PyTorch
        # reference; no separate argmax/one-hot pass over HBM).
        g = gt.reshape(B, C, S)
    else:
        lab_dtype = jnp.int8 if C <= 127 else jnp.int32
        g = gt.reshape(B, 1, S).astype(lab_dtype)

    sum_se, sum_sey, sum_y = _ss_partial_sums(x, g, dense_gt, tile_bytes)  # (B, C) f32 each

    if batch_dice:   # reduce over batch as well (axes [0, 2, 3...] in the reference)
        sum_se = jnp.sum(sum_se, axis=0)
        sum_sey = jnp.sum(sum_sey, axis=0)
        sum_y = jnp.sum(sum_y, axis=0)
        n_elems = float(B * S)
    else:
        n_elems = float(S)

    specificity = sum_sey / (sum_y + smooth)
    sensitivity = (sum_se - sum_sey) / ((n_elems - sum_y) + smooth)
    ss = r * specificity + (1.0 - r) * sensitivity
    if not do_bg:
        ss = ss[..., 1:]
    return jnp.mean(ss)


# ---------------- pure-JAX reference (mirrors the PyTorch module) -------------
def _ss_loss_ref(net_output, gt, *, batch_dice=False, do_bg=True,
                 smooth=1.0, r=0.1):
    x = net_output.astype(jnp.float32)
    C = x.shape[1]
    if gt.ndim != x.ndim:
        gt = gt.reshape((gt.shape[0], 1) + tuple(gt.shape[1:]))
    if gt.shape == x.shape:
        y = gt.astype(jnp.float32)
    else:
        y = jax.nn.one_hot(gt[:, 0].astype(jnp.int32), C, axis=1,
                           dtype=jnp.float32)
    axes = ((0,) + tuple(range(2, x.ndim))) if batch_dice else tuple(range(2, x.ndim))
    bg = 1.0 - y
    se = (y - x) ** 2
    spec = jnp.sum(se * y, axis=axes) / (jnp.sum(y, axis=axes) + smooth)
    sens = jnp.sum(se * bg, axis=axes) / (jnp.sum(bg, axis=axes) + smooth)
    ss = r * spec + (1.0 - r) * sens
    if not do_bg:
        ss = ss[..., 1:]
    return jnp.mean(ss)


if __name__ == "__main__":
    key = jax.random.PRNGKey(0)
    k1, k2, k3, k4, k5, k6, k7 = jax.random.split(key, 7)

    # ---- 1) default config, f32, S = 256 (lane-packed path, single tile) ----
    B, C, H, W = 2, 4, 16, 16
    net = jax.random.normal(k1, (B, C, H, W), dtype=jnp.float32)
    gt = jax.random.randint(k2, (B, H, W), 0, C, dtype=jnp.int32)
    loss = jax.block_until_ready(ss_loss(net, gt))
    ref = jax.block_until_ready(_ss_loss_ref(net, gt))
    assert np.allclose(np.asarray(loss), np.asarray(ref), rtol=1e-5, atol=1e-5), (
        f"mismatch (f32): pallas={loss} ref={ref}")

    # ---- 2) bf16 input, multi-tile lane-packed path with masked tail + fold ----
    net2 = jax.random.normal(k3, (B, C, 96, 96), dtype=jnp.bfloat16)   # S=9216, G=72
    gt2 = jax.random.randint(k4, (B, 96, 96), 0, C, dtype=jnp.int32)
    loss2 = jax.block_until_ready(ss_loss(net2, gt2, tile_bytes=65536))  # TR=64 -> 2 tiles
    ref2 = jax.block_until_ready(_ss_loss_ref(net2.astype(jnp.float32), gt2))
    assert np.allclose(np.asarray(loss2), np.asarray(ref2), rtol=1e-4, atol=1e-4), (
        f"mismatch (bf16): pallas={loss2} ref={ref2}")

    # ---- 3) ragged S (fallback path), masked tail, batch_dice, do_bg=False ----
    net3 = jax.random.normal(k5, (B, C, 40, 60), dtype=jnp.float32)    # S=2400 (not %128)
    gt3 = jax.random.randint(k6, (B, 40, 60), 0, C, dtype=jnp.int32)
    loss3 = jax.block_until_ready(
        ss_loss(net3, gt3, batch_dice=True, do_bg=False, tile_bytes=32768))  # TS=2048
    ref3 = jax.block_until_ready(
        _ss_loss_ref(net3, gt3, batch_dice=True, do_bg=False))
    assert np.allclose(np.asarray(loss3), np.asarray(ref3), rtol=1e-5, atol=1e-5), (
        f"mismatch (tail/batch_dice): pallas={loss3} ref={ref3}")

    # ---- 4) full-shape soft gt streamed directly (no argmax pass) ----
    gt_soft = jax.nn.softmax(jax.random.normal(k7, (B, C, H, W), dtype=jnp.float32), axis=1)
    loss4 = jax.block_until_ready(ss_loss(net, gt_soft))
    ref4 = jax.block_until_ready(_ss_loss_ref(net, gt_soft))
    assert np.allclose(np.asarray(loss4), np.asarray(ref4), rtol=1e-5, atol=1e-5), (
        f"mismatch (soft gt): pallas={loss4} ref={ref4}")

    print("KERNEL_OK")
</pallas_src>

<mosaic_0001>
module attributes {stable_mosaic.version = 11 : i64} {
  func.func @kernel(%arg0: i32, %arg1: i32, %arg2: memref<1x1x2x128xi8, #tpu.memory_space<vmem>>, %arg3: memref<1x4x2x128xf32, #tpu.memory_space<vmem>>, %arg4: memref<1x4x1xf32, #tpu.memory_space<vmem>>, %arg5: memref<1x4x1xf32, #tpu.memory_space<vmem>>, %arg6: memref<1x4x1xf32, #tpu.memory_space<vmem>>, %arg7: memref<4x2x128xf32, #tpu.memory_space<vmem>>, %arg8: memref<4x2x128xf32, #tpu.memory_space<vmem>>, %arg9: memref<4x2x128xf32, #tpu.memory_space<vmem>>) attributes {dimension_semantics = [#tpu.dimension_semantics<parallel>, #tpu.dimension_semantics<arbitrary>], iteration_bounds = array<i64: 2, 1>, scalar_prefetch = 0 : i64, scratch_operands = 3 : i64, tpu.core_type = #tpu.core_type<tc>, window_params = [{transform_indices = @transform_0, window_bounds = array<i64: 1, 1, 2, 128>}, {transform_indices = @transform_1, window_bounds = array<i64: 1, 4, 2, 128>}, {transform_indices = @transform_2, window_bounds = array<i64: 1, 4, 1>}, {transform_indices = @transform_3, window_bounds = array<i64: 1, 4, 1>}, {transform_indices = @transform_4, window_bounds = array<i64: 1, 4, 1>}]} {
    %c0_i32 = arith.constant 0 : i32
    %0 = arith.cmpi eq, %arg1, %c0_i32 : i32
    %1 = arith.extui %0 : i1 to i32
    %c0_i32_0 = arith.constant 0 : i32
    %2 = arith.cmpi ne, %1, %c0_i32_0 : i32
    scf.if %2 {
      %cst = arith.constant 0.000000e+00 : f32
      %28 = vector.broadcast %cst : f32 to vector<4x2x128xf32>
      %c0_28 = arith.constant 0 : index
      %c0_29 = arith.constant 0 : index
      %c0_30 = arith.constant 0 : index
      %29 = vector.load %arg7[%c0_28, %c0_29, %c0_30] : memref<4x2x128xf32, #tpu.memory_space<vmem>>, vector<4x2x128xf32>
      tpu.vector_store %arg7[%c0_28, %c0_29, %c0_30], %28 {strides = array<i32>} : memref<4x2x128xf32, #tpu.memory_space<vmem>>, vector<4x2x128xf32>,
      %cst_31 = arith.constant 0.000000e+00 : f32
      %30 = vector.broadcast %cst_31 : f32 to vector<4x2x128xf32>
      %c0_32 = arith.constant 0 : index
      %c0_33 = arith.constant 0 : index
      %c0_34 = arith.constant 0 : index
      %31 = vector.load %arg8[%c0_32, %c0_33, %c0_34] : memref<4x2x128xf32, #tpu.memory_space<vmem>>, vector<4x2x128xf32>
      tpu.vector_store %arg8[%c0_32, %c0_33, %c0_34], %30 {strides = array<i32>} : memref<4x2x128xf32, #tpu.memory_space<vmem>>, vector<4x2x128xf32>,
      %cst_35 = arith.constant 0.000000e+00 : f32
      %32 = vector.broadcast %cst_35 : f32 to vector<4x2x128xf32>
      %c0_36 = arith.constant 0 : index
      %c0_37 = arith.constant 0 : index
      %c0_38 = arith.constant 0 : index
      %33 = vector.load %arg9[%c0_36, %c0_37, %c0_38] : memref<4x2x128xf32, #tpu.memory_space<vmem>>, vector<4x2x128xf32>
      tpu.vector_store %arg9[%c0_36, %c0_37, %c0_38], %32 {strides = array<i32>} : memref<4x2x128xf32, #tpu.memory_space<vmem>>, vector<4x2x128xf32>,
    } else {
    }
    %c0 = arith.constant 0 : index
    %c0_1 = arith.constant 0 : index
    %c0_2 = arith.constant 0 : index
    %c0_3 = arith.constant 0 : index
    %3 = vector.load %arg3[%c0, %c0_1, %c0_2, %c0_3] : memref<1x4x2x128xf32, #tpu.memory_space<vmem>>, vector<1x4x2x128xf32>
    %4 = vector.shape_cast %3 : vector<1x4x2x128xf32> to vector<4x2x128xf32>
    %5 = tpu.iota {dimensions = array<i32: 0>} : vector<4x2x128xi32>
    %c0_4 = arith.constant 0 : index
    %c0_5 = arith.constant 0 : index
    %c0_6 = arith.constant 0 : index
    %c0_7 = arith.constant 0 : index
    %6 = vector.load %arg2[%c0_4, %c0_5, %c0_6, %c0_7] : memref<1x1x2x128xi8, #tpu.memory_space<vmem>>, vector<1x1x2x128xi8>
    %7 = vector.shape_cast %6 : vector<1x1x2x128xi8> to vector<1x2x128xi8>
    %8 = arith.extsi %7 : vector<1x2x128xi8> to vector<1x2x128xi32>
    %9 = vector.broadcast %8 : vector<1x2x128xi32> to vector<4x2x128xi32>
    %10 = arith.cmpi eq, %9, %5 : vector<4x2x128xi32>
    %11 = arith.extui %10 : vector<4x2x128xi1> to vector<4x2x128xi32>
    %12 = arith.sitofp %11 : vector<4x2x128xi32> to vector<4x2x128xf32>
    %13 = arith.subf %12, %4 : vector<4x2x128xf32>
    %14 = arith.mulf %13, %13 : vector<4x2x128xf32>
    %15 = arith.mulf %14, %12 : vector<4x2x128xf32>
    %c0_8 = arith.constant 0 : index
    %c0_9 = arith.constant 0 : index
    %c0_10 = arith.constant 0 : index
    %16 = vector.load %arg7[%c0_8, %c0_9, %c0_10] : memref<4x2x128xf32, #tpu.memory_space<vmem>>, vector<4x2x128xf32>
    %17 = arith.addf %16, %14 : vector<4x2x128xf32>
    %c0_11 = arith.constant 0 : index
    %c0_12 = arith.constant 0 : index
    %c0_13 = arith.constant 0 : index
    %18 = vector.load %arg7[%c0_11, %c0_12, %c0_13] : memref<4x2x128xf32, #tpu.memory_space<vmem>>, vector<4x2x128xf32>
    tpu.vector_store %arg7[%c0_11, %c0_12, %c0_13], %17 {strides = array<i32>} : memref<4x2x128xf32, #tpu.memory_space<vmem>>, vector<4x2x128xf32>,
    %c0_14 = arith.constant 0 : index
    %c0_15 = arith.constant 0 : index
    %c0_16 = arith.constant 0 : index
    %19 = vector.load %arg8[%c0_14, %c0_15, %c0_16] : memref<4x2x128xf32, #tpu.memory_space<vmem>>, vector<4x2x128xf32>
    %20 = arith.addf %19, %15 : vector<4x2x128xf32>
    %c0_17 = arith.constant 0 : index
    %c0_18 = arith.constant 0 : index
    %c0_19 = arith.constant 0 : index
    %21 = vector.load %arg8[%c0_17, %c0_18, %c0_19] : memref<4x2x128xf32, #tpu.memory_space<vmem>>, vector<4x2x128xf32>
    tpu.vector_store %arg8[%c0_17, %c0_18, %c0_19], %20 {strides = array<i32>} : memref<4x2x128xf32, #tpu.memory_space<vmem>>, vector<4x2x128xf32>,
    %c0_20 = arith.constant 0 : index
    %c0_21 = arith.constant 0 : index
    %c0_22 = arith.constant 0 : index
    %22 = vector.load %arg9[%c0_20, %c0_21, %c0_22] : memref<4x2x128xf32, #tpu.memory_space<vmem>>, vector<4x2x128xf32>
    %23 = arith.addf %22, %12 : vector<4x2x128xf32>
    %c0_23 = arith.constant 0 : index
    %c0_24 = arith.constant 0 : index
    %c0_25 = arith.constant 0 : index
    %24 = vector.load %arg9[%c0_23, %c0_24, %c0_25] : memref<4x2x128xf32, #tpu.memory_space<vmem>>, vector<4x2x128xf32>
    tpu.vector_store %arg9[%c0_23, %c0_24, %c0_25], %23 {strides = array<i32>} : memref<4x2x128xf32, #tpu.memory_space<vmem>>, vector<4x2x128xf32>,
    %c0_i32_26 = arith.constant 0 : i32
    %25 = arith.cmpi eq, %arg1, %c0_i32_26 : i32
    %26 = arith.extui %25 : i1 to i32
    %c0_i32_27 = arith.constant 0 : i32
    %27 = arith.cmpi ne, %26, %c0_i32_27 : i32
    scf.if %27 {
      %c0_28 = arith.constant 0 : index
      %c0_29 = arith.constant 0 : index
      %c0_30 = arith.constant 0 : index
      %28 = vector.load %arg7[%c0_28, %c0_29, %c0_30] : memref<4x2x128xf32, #tpu.memory_space<vmem>>, vector<4x2x128xf32>
      %cst = arith.constant dense<0.000000e+00> : vector<4x2xf32>
      %29 = vector.multi_reduction <add>, %28, %cst [2] : vector<4x2x128xf32> to vector<4x2xf32>
      %cst_31 = arith.constant dense<0.000000e+00> : vector<4xf32>
      %30 = vector.multi_reduction <add>, %29, %cst_31 [1] : vector<4x2xf32> to vector<4xf32>
      %31 = vector.shape_cast %30 : vector<4xf32> to vector<4x1xf32>
      %c0_32 = arith.constant 0 : index
      %c0_33 = arith.constant 0 : index
      %c0_34 = arith.constant 0 : index
      %32 = vector.load %arg4[%c0_32, %c0_33, %c0_34] : memref<1x4x1xf32, #tpu.memory_space<vmem>>, vector<1x4x1xf32>
      %33 = vector.shape_cast %32 : vector<1x4x1xf32> to vector<4x1xf32>
      %34 = vector.shape_cast %31 : vector<4x1xf32> to vector<1x4x1xf32>
      tpu.vector_store %arg4[%c0_32, %c0_33, %c0_34], %34 {strides = array<i32>} : memref<1x4x1xf32, #tpu.memory_space<vmem>>, vector<1x4x1xf32>,
      %c0_35 = arith.constant 0 : index
      %c0_36 = arith.constant 0 : index
      %c0_37 = arith.constant 0 : index
      %35 = vector.load %arg8[%c0_35, %c0_36, %c0_37] : memref<4x2x128xf32, #tpu.memory_space<vmem>>, vector<4x2x128xf32>
      %cst_38 = arith.constant dense<0.000000e+00> : vector<4x2xf32>
      %36 = vector.multi_reduction <add>, %35, %cst_38 [2] : vector<4x2x128xf32> to vector<4x2xf32>
      %cst_39 = arith.constant dense<0.000000e+00> : vector<4xf32>
      %37 = vector.multi_reduction <add>, %36, %cst_39 [1] : vector<4x2xf32> to vector<4xf32>
      %38 = vector.shape_cast %37 : vector<4xf32> to vector<4x1xf32>
      %c0_40 = arith.constant 0 : index
      %c0_41 = arith.constant 0 : index
      %c0_42 = arith.constant 0 : index
      %39 = vector.load %arg5[%c0_40, %c0_41, %c0_42] : memref<1x4x1xf32, #tpu.memory_space<vmem>>, vector<1x4x1xf32>
      %40 = vector.shape_cast %39 : vector<1x4x1xf32> to vector<4x1xf32>
      %41 = vector.shape_cast %38 : vector<4x1xf32> to vector<1x4x1xf32>
      tpu.vector_store %arg5[%c0_40, %c0_41, %c0_42], %41 {strides = array<i32>} : memref<1x4x1xf32, #tpu.memory_space<vmem>>, vector<1x4x1xf32>,
      %c0_43 = arith.constant 0 : index
      %c0_44 = arith.constant 0 : index
      %c0_45 = arith.constant 0 : index
      %42 = vector.load %arg9[%c0_43, %c0_44, %c0_45] : memref<4x2x128xf32, #tpu.memory_space<vmem>>, vector<4x2x128xf32>
      %cst_46 = arith.constant dense<0.000000e+00> : vector<4x2xf32>
      %43 = vector.multi_reduction <add>, %42, %cst_46 [2] : vector<4x2x128xf32> to vector<4x2xf32>
      %cst_47 = arith.constant dense<0.000000e+00> : vector<4xf32>
      %44 = vector.multi_reduction <add>, %43, %cst_47 [1] : vector<4x2xf32> to vector<4xf32>
      %45 = vector.shape_cast %44 : vector<4xf32> to vector<4x1xf32>
      %c0_48 = arith.constant 0 : index
      %c0_49 = arith.constant 0 : index
      %c0_50 = arith.constant 0 : index
      %46 = vector.load %arg6[%c0_48, %c0_49, %c0_50] : memref<1x4x1xf32, #tpu.memory_space<vmem>>, vector<1x4x1xf32>
      %47 = vector.shape_cast %46 : vector<1x4x1xf32> to vector<4x1xf32>
      %48 = vector.shape_cast %45 : vector<4x1xf32> to vector<1x4x1xf32>
      tpu.vector_store %arg6[%c0_48, %c0_49, %c0_50], %48 {strides = array<i32>} : memref<1x4x1xf32, #tpu.memory_space<vmem>>, vector<1x4x1xf32>,
    } else {
    }
    return
  }
  func.func @transform_0(%arg0: i32, %arg1: i32) -> (i32, i32, i32, i32) {
    %c0_i32 = arith.constant 0 : i32
    %c0_i32_0 = arith.constant 0 : i32
    %c0_i32_1 = arith.constant 0 : i32
    return %arg0, %c0_i32, %arg1, %c0_i32_0 : i32, i32, i32, i32
  }
  func.func @transform_1(%arg0: i32, %arg1: i32) -> (i32, i32, i32, i32) {
    %c0_i32 = arith.constant 0 : i32
    %c0_i32_0 = arith.constant 0 : i32
    %c0_i32_1 = arith.constant 0 : i32
    return %arg0, %c0_i32, %arg1, %c0_i32_0 : i32, i32, i32, i32
  }
  func.func @transform_2(%arg0: i32, %arg1: i32) -> (i32, i32, i32) {
    %c0_i32 = arith.constant 0 : i32
    %c0_i32_0 = arith.constant 0 : i32
    %c0_i32_1 = arith.constant 0 : i32
    return %arg0, %c0_i32, %c0_i32_0 : i32, i32, i32
  }
  func.func @transform_3(%arg0: i32, %arg1: i32) -> (i32, i32, i32) {
    %c0_i32 = arith.constant 0 : i32
    %c0_i32_0 = arith.constant 0 : i32
    %c0_i32_1 = arith.constant 0 : i32
    return %arg0, %c0_i32, %c0_i32_0 : i32, i32, i32
  }
  func.func @transform_4(%arg0: i32, %arg1: i32) -> (i32, i32, i32) {
    %c0_i32 = arith.constant 0 : i32
    %c0_i32_0 = arith.constant 0 : i32
    %c0_i32_1 = arith.constant 0 : i32
    return %arg0, %c0_i32, %c0_i32_0 : i32, i32, i32
  }
}

</mosaic_0001>

<bundles_post_ra>
// kernel: tpu_custom_call.1
= control target key start
LH: loop header
LB: loop body
LE: loop exit
PB: predicated region body
PF: predicated region fallthrough
CT: control target
= control target key end

     0   :  { %10 = vsyncpa [#allocation6], 0  ;;  %s1010_s0 = inlined_call_operand.hbm [shape: s8[2,1,2,128], index: 0, kind: input, shape index: {}]   ;;  %s1011_s1 = inlined_call_operand.hbm [shape: f32[2,4,2,128], index: 1, kind: input, shape index: {}]   ;;  %s1012_s2 = inlined_call_operand.vmem [shape: f32[2,4,1], index: 2, kind: output, shape index: {0}]   ;;  %s1013_s3 = inlined_call_operand.vmem [shape: f32[2,4,1], index: 3, kind: output, shape index: {1}]   ;;  %s1014_s4 = inlined_call_operand.vmem [shape: f32[2,4,1], index: 4, kind: output, shape index: {2}]  }
   0x1   :  { %12 = vsyncpa [#allocation6 + $0x1], 0 }
   0x2   :  { %13 = vsyncpa [#allocation8], 0 }
   0x3   :  { %15 = vsyncpa [#allocation8 + $0x1], 0  ;;  %s864_s15 = smov 0   ;;  %s866_s16 = smov 0  }
   0x4   :  { %s868_s17 = smov 0   ;;  %s870_s18 = smov 0  }
   0x5   :  { %s872_s19 = smov 0   ;;  %s874_s20 = smov 0  }
   0x6 LB: > { %s638_s21 = sadd.s32 4294967295, %s834_s20   ;;  %s33_s22 = sadd.s32 1, %s830_s19  ;;  %s834_s20 = sphi %s874_s20, %s21_s20   ;;  %s830_s19 = sphi %s872_s19, %s1022_s19   ;;  %s826_s18 = sphi %s870_s18, %s1021_s18   ;;  %s822_s17 = sphi %s868_s17, %s1020_s17   ;;  %s818_s16 = sphi %s866_s16, %s1019_s16   ;;  %s814_s15 = sphi %s864_s15, %s1018_s15  }
   0x7   : > { %p35_p0 = scmp.ge.s32.totalorder %s33_s22, 2  ;;  %s42_s23 = sadd.s32 1, %s822_s17 }
   0x8   : > { %p49_p1 = scmp.ne.s32.totalorder %s822_s17, %s818_s16  ;;  %p50_p2 = scmp.eq.s32.totalorder %s834_s20, 0 }
   0x9   : > { %s1024_s22 = smov (%p35_p0, %s33_s22), 0  ;;  %p55_p4 = scmp.ne.s32.totalorder %s818_s16, %s814_s15 }
   0xa   : > { %p900_p3 = por %p50_p2, %p49_p1  ;;  %s37_s25 = ssub.s32 %s830_s19, %s1024_s22 }
   0xb   : > { %p56_p5 = scmp.eq.s32.totalorder %s638_s21, 0  ;;  %p40_p6 = scmp.eq.s32.totalorder %s37_s25, 0 }
   0xc   : > { %p668_p8 = scmp.lt.s32.totalorder %s834_s20, 2  ;;  %s916_s28 = sand.u32 1, %s822_s17  }
   0xd   : > { %p907_p7 = por %p56_p5, %p55_p4  ;;  %s192_s5 = scalar_lea.hbm %s1010_s0, %s830_s19 }
   0xe   : > { %s913_s27 = scalar_select %p40_p6, %s822_s17, %s42_s23  }
   0xf   : > { %s194_s6 = sshll.u32 %s192_s5, 4  ;;  %s188_s7 = scalar_lea.vmem [#allocation5], %s916_s28  ;;  %s195_s6 = int_to_ptr.hbm [resolvable:$true] %s194_s6 }
  0x10   : > { %s196_s8 = sshll.u32 %s188_s7, 4  ;;  %p925_p9 = pnand %p668_p8, %p900_p3  ;;  %s197_s8 = int_to_ptr.vmem [resolvable:$true] %s196_s8 }
  0x11   : > { %p645_p10 = scmp.ge.s32.totalorder %s834_s20, 1  ;;  %p224_p11 = scmp.lt.s32.totalorder %s834_s20, 3 }
  0x12   : > { %s642_s10 = sshll.u32 %s916_s28, 3  ;;  %s186_s11 = scalar_lea.sflag [#allocation6], %s916_s28 }
  0x13   : > { %664 = dma.hbm_to_vmem [thread:$0]  (!%p925_p9), %s195_s6, 16, %s197_s8, %s186_s11  }
  0x14   : > { %p225_p12 = pnand %p645_p10, %p224_p11  ;;  %s656_s12 = sshll.u32 %s830_s19, 3 }
  0x15   : > { %s207_s13 = scalar_lea.vmem [#allocation7], %s642_s10  ;;  %s213_s23 = scalar_lea.hbm %s1011_s1, %s656_s12 }
  0x16   : > { %s216_s14 = sshll.u32 %s207_s13, 4  ;;  %s214_s24 = sshll.u32 %s213_s23, 4  ;;  %s217_s14 = int_to_ptr.vmem [resolvable:$true] %s216_s14  ;;  %s215_s24 = int_to_ptr.hbm [resolvable:$true] %s214_s24 }
  0x17   : > { %s204_s25 = scalar_lea.sflag [#allocation8], %s916_s28  ;;  %s836_s29 = smov 32  }
  0x18   : > { %s837_s30 = smov 2   ;;  %228 = sbr.rel (%p225_p12) target bundleno = 319 (0x13f), region = 28 }
  0x19   : > { %667 = dma.hbm_to_vmem [thread:$0]  (!%p925_p9), %s215_s24, 128, %s217_s14, %s204_s25, %s836_s29, %s836_s29, %s837_s30  }
  0x1a   : > { %s230_s5 = sand.u32 (!%p225_p12), 1, %s818_s16  }
  0x1b   : > { %s231_s6 = scalar_lea.sflag (!%p225_p12), [#allocation6], %s230_s5  ;;  %s233_s7 = scalar_lea.vmem (!%p225_p12), [#allocation5], %s230_s5 }
  0x1d   : > { %805 = dma.done.wait (%p907_p7), %s231_s6, 16  }
  0x1e   : > { %807 = vsyncadd (%p907_p7), %s231_s6, 4294967280  ;;  %s646_s8 = sshll.u32 %s230_s5, 3  ;;  %s240_s10 = scalar_lea.sflag [#allocation8], %s230_s5 }
  0x1f   : > { %s947_s11 = scalar_lea.vmem [#allocation7], %s646_s8 }
  0x20   : > { %809 = dma.done.wait (%p907_p7), %s240_s10, 128  }
  0x21   : > { %811 = vsyncadd (%p907_p7), %s240_s10, 4294967168  ;;  %v838_v0 = vmov 0.0   ;;  %v312_v1 = vld [vmem:[%s233_s7] sm:$0x1]  ;;  %v308_v3 = vld [vmem:[%s947_s11] sm:$0x3] }
  0x22   : > { %304 = vst [vmem:[#allocation4] sm:$0x3] %v838_v0  ;;  %v313_v2 = vunpack.c.0.s8 %v312_v1  ;;  %v309_v5 = vld [vmem:[%s947_s11 + $0x2] sm:$0x3]  ;;  %v310_v6 = vld [vmem:[%s947_s11 + $0x4] sm:$0x3] }
  0x23   : > { %296 = vst [vmem:[#allocation2] sm:$0x3] %v838_v0  ;;  %v311_v17 = vld [vmem:[%s947_s11 + $0x6] sm:$0x3]  ;;  %vm381_vm4 = vcmask 1041408   ;;  %vm404_vm5 = vcmask 1041409  }
  0x24   : > { %297 = vst [vmem:[#allocation2 + $0x2] sm:$0x3] %v838_v0  ;;  %vm314_vm0 = vcmp.eq.s32.totalorder %v313_v2, 0  ;;  %vm315_vm1 = vcmp.eq.s32.totalorder %v313_v2, 1  ;;  %vm316_vm2 = vcmp.eq.s32.totalorder %v313_v2, 2  ;;  %vm317_vm3 = vcmp.eq.s32.totalorder %v313_v2, 3 }
  0x25   : > { %298 = vst [vmem:[#allocation2 + $0x4] sm:$0x3] %v838_v0  ;;  %v650_v7 = vsel %vm314_vm0, 1.0, %v838_v0  ;;  %v651_v8 = vsel %vm315_vm1, 1.0, %v838_v0  ;;  %v652_v13 = vsel %vm316_vm2, 1.0, %v838_v0  ;;  %v653_v16 = vsel %vm317_vm3, 1.0, %v838_v0 }
  0x26   : > { %299 = vst [vmem:[#allocation2 + $0x6] sm:$0x3] %v838_v0  ;;  %v326_v10 = vsub.f32 %v650_v7, %v308_v3  ;;  %v327_v12 = vsub.f32 %v651_v8, %v309_v5  ;;  %v328_v15 = vsub.f32 %v652_v13, %v310_v6  ;;  %v329_v20 = vsub.f32 %v653_v16, %v311_v17  ;;  %p280_p13 = scmp.lt.s32.totalorder %s826_s18, 1 }
  0x27   : > { %300 = vst [vmem:[#allocation3] sm:$0x3] %v838_v0  ;;  %vm406_vm6 = vcmask 1042434   ;;  %vm408_vm7 = vcmask 1043459   ;;  %vm411_vm8 = vcmask 11264   ;;  %vm415_vm9 = vcmask 3072  }
  0x28   : > { %301 = vst [vmem:[#allocation3 + $0x2] sm:$0x3] %v838_v0  ;;  %v330_v18 = vmul.f32 %v326_v10, %v326_v10  ;;  %v331_v19 = vmul.f32 %v327_v12, %v327_v12  ;;  %v332_v23 = vmul.f32 %v328_v15, %v328_v15  ;;  %v333_v31 = vmul.f32 %v329_v20, %v329_v20  ;;  %s1026_s18 = smov (!%p280_p13, %s826_s18), 1 }
  0x29   : > { %302 = vst [vmem:[#allocation3 + $0x4] sm:$0x3] %v838_v0  ;;  %v362_v4 = vld [vmem:[#allocation4] sm:$0x3]  ;;  %s647_s26 = sshll.u32 %s1026_s18, 2 }
  0x2a   : > { %303 = vst [vmem:[#allocation3 + $0x6] sm:$0x3] %v838_v0  ;;  %v366_v9 = vadd.f32 %v650_v7, %v362_v4  ;;  %v338_v11 = vld [vmem:[#allocation2] sm:$0x3]  ;;  %v334_v25 = vmul.f32 %v650_v7, %v330_v18  ;;  %v335_v27 = vmul.f32 %v651_v8, %v331_v19  ;;  %v336_v30 = vmul.f32 %v652_v13, %v332_v23  ;;  %s291_s12 = scalar_lea.vmem %s1014_s4, %s647_s26  ;;  %s283_s15 = scalar_lea.vmem %s1012_s2, %s647_s26 }
  0x2b   : > { %305 = vst [vmem:[#allocation4 + $0x2] sm:$0x3] %v838_v0  ;;  %v339_v14 = vld [vmem:[#allocation2 + $0x2] sm:$0x3]  ;;  %v342_v24 = vadd.f32 %v338_v11, %v330_v18  ;;  %v337_v41 = vmul.f32 %v653_v16, %v333_v31  ;;  %s287_s24 = scalar_lea.vmem %s1013_s3, %s647_s26 }
  0x2c   : > { %306 = vst [vmem:[#allocation4 + $0x4] sm:$0x3] %v838_v0  ;;  %v343_v26 = vadd.f32 %v339_v14, %v331_v19  ;;  %v340_v29 = vld [vmem:[#allocation2 + $0x4] sm:$0x3] }
  0x2d   : > { %307 = vst [vmem:[#allocation4 + $0x6] sm:$0x3] %v838_v0  ;;  %v344_v39 = vadd.f32 %v340_v29, %v332_v23  ;;  %v341_v40 = vld [vmem:[#allocation2 + $0x6] sm:$0x3] }
  0x2e   : > { %370 = vst [vmem:[#allocation4] sm:$0x3] %v366_v9  ;;  %v350_v21 = vld [vmem:[#allocation3] sm:$0x3]  ;;  %v345_v47 = vadd.f32 %v341_v40, %v333_v31 }
  0x2f   : > { %v351_v22 = vld [vmem:[#allocation3 + $0x2] sm:$0x3]  ;;  %346 = vst [vmem:[#allocation2] sm:$0x3] %v342_v24  ;;  %v354_v32 = vadd.f32 %v350_v21, %v334_v25 }
  0x30   : > { %v355_v34 = vadd.f32 %v351_v22, %v335_v27  ;;  %v352_v36 = vld [vmem:[#allocation3 + $0x4] sm:$0x3]  ;;  %347 = vst [vmem:[#allocation2 + $0x2] sm:$0x3] %v343_v26 }
  0x31   : > { %358 = vst [vmem:[#allocation3] sm:$0x3] %v354_v32  ;;  %v356_v43 = vadd.f32 %v352_v36, %v336_v30  ;;  %v353_v44 = vld [vmem:[#allocation3 + $0x6] sm:$0x3] }
  0x32   : > { %v363_v28 = vld [vmem:[#allocation4 + $0x2] sm:$0x3]  ;;  %359 = vst [vmem:[#allocation3 + $0x2] sm:$0x3] %v355_v34  ;;  %v357_v48 = vadd.f32 %v353_v44, %v337_v41 }
  0x33   : > { %v367_v33 = vadd.f32 %v651_v8, %v363_v28  ;;  %v364_v35 = vld [vmem:[#allocation4 + $0x4] sm:$0x3]  ;;  %348 = vst [vmem:[#allocation2 + $0x4] sm:$0x3] %v344_v39 }
  0x34   : > { %v368_v37 = vadd.f32 %v652_v13, %v364_v35  ;;  %v365_v38 = vld [vmem:[#allocation4 + $0x6] sm:$0x3]  ;;  %360 = vst [vmem:[#allocation3 + $0x4] sm:$0x3] %v356_v43  ;;  %v398_v13 = vlaneseq }
  0x35   : > { %v449_v42 = vld [vmem:[#allocation4] sm:$0x3]  ;;  %371 = vst [vmem:[#allocation4 + $0x2] sm:$0x3] %v367_v33  ;;  %v369_v46 = vadd.f32 %v653_v16, %v365_v38 }
  0x36   : > { %v453_v45 = vsel %vm381_vm4, %v449_v42, 0.0  ;;  %372 = vst [vmem:[#allocation4 + $0x4] sm:$0x3] %v368_v37  ;;  %v377_v49 = vld [vmem:[#allocation2] sm:$0x3]  ;;  %v399_v15 = vand.u32 127, %v398_v13 }
  0x37   : > { %454 = vadd.xlane.f32.xlu2 %v453_v45  ;;  %v382_v50 = vsel %vm381_vm4, %v377_v49, 0.0  ;;  %373 = vst [vmem:[#allocation4 + $0x6] sm:$0x3] %v369_v46  ;;  %v378_v55 = vld [vmem:[#allocation2 + $0x2] sm:$0x3] }
  0x38   : > { %383 = vadd.xlane.f32.xlu0 %v382_v50  ;;  %v417_v51 = vld [vmem:[#allocation3] sm:$0x3]  ;;  %349 = vst [vmem:[#allocation2 + $0x6] sm:$0x3] %v345_v47  ;;  %v385_v57 = vsel %vm381_vm4, %v378_v55, 0.0 }
  0x39   : > { %v421_v52 = vsel %vm381_vm4, %v417_v51, 0.0  ;;  %361 = vst [vmem:[#allocation3 + $0x6] sm:$0x3] %v357_v48  ;;  %v418_v56 = vld [vmem:[#allocation3 + $0x2] sm:$0x3] }
  0x3a   : > { %422 = vadd.xlane.f32.xlu1 %v421_v52  ;;  %v424_v59 = vsel %vm381_vm4, %v418_v56, 0.0  ;;  %v379_v61 = vld [vmem:[#allocation2 + $0x4] sm:$0x3] }
  0x3b   : > { %v419_v62 = vld [vmem:[#allocation3 + $0x4] sm:$0x3]  ;;  %v388_v63 = vsel %vm381_vm4, %v379_v61, 0.0 }
  0x3c   : > { %v450_v53 = vld [vmem:[#allocation4 + $0x2] sm:$0x3]  ;;  %v427_v1 = vsel %vm381_vm4, %v419_v62, 0.0 }
  0x3d   : > { %v456_v54 = vsel %vm381_vm4, %v450_v53, 0.0  ;;  %v451_v58 = vld [vmem:[#allocation4 + $0x4] sm:$0x3] }
  0x3e   : > { %v459_v60 = vsel %vm381_vm4, %v451_v58, 0.0  ;;  %v452_v0 = vld [vmem:[#allocation4 + $0x6] sm:$0x3] }
  0x3f   : > { %457 = vadd.xlane.f32.xlu2 %v456_v54  ;;  %v462_v2 = vsel %vm381_vm4, %v452_v0, 0.0  ;;  %v380_v3 = vld [vmem:[#allocation2 + $0x6] sm:$0x3] }
  0x40   : > { %386 = vadd.xlane.f32.xlu0 %v385_v57  ;;  %v420_v4 = vld [vmem:[#allocation3 + $0x6] sm:$0x3]  ;;  %v391_v5 = vsel %vm381_vm4, %v380_v3, 0.0 }
  0x41   : > { %v430_v6 = vsel %vm381_vm4, %v420_v4, 0.0 }
  0x42   : > { %425 = vadd.xlane.f32.xlu1 %v424_v59 }
  0x47   : > { %460 = vadd.xlane.f32.xlu2 %v459_v60 }
  0x48   : > { %389 = vadd.xlane.f32.xlu0 %v388_v63 }
  0x4a   : > { %428 = vadd.xlane.f32.xlu1 %v427_v1 }
  0x4f   : > { %463 = vadd.xlane.f32.xlu2 %v462_v2 }
  0x50   : > { %392 = vadd.xlane.f32.xlu0 %v391_v5 }
  0x52   : > { %431 = vadd.xlane.f32.xlu1 %v430_v6 }
  0xaa   : > { %v455_v7 = vpop.xlane.xlu2 %454 }
  0xab   : > { %v384_v8 = vpop.xlane.xlu0 %383  ;;  %v469_v20 = vperm.slane %v455_v7, %v399_v15 }
  0xac   : > { %v400_v27 = vperm.slane %v384_v8, %v399_v15 }
  0xad   : > { %v423_v9 = vpop.xlane.xlu1 %422 }
  0xae   : > { %v437_v33 = vperm.slane %v423_v9, %v399_v15 }
  0xb2   : > { %v458_v10 = vpop.xlane.xlu2 %457 }
  0xb3   : > { %v387_v11 = vpop.xlane.xlu0 %386  ;;  %v470_v17 = vperm.slane %v458_v10, %v399_v15 }
  0xb4   : > { %v401_v23 = vperm.slane %v387_v11, %v399_v15 }
  0xb5   : > { %v426_v12 = vpop.xlane.xlu1 %425  ;;  %v473_v22 = vsel %vm404_vm5, %v470_v17, %v469_v20 }
  0xb6   : > { %v438_v28 = vperm.slane %v426_v12, %v399_v15  ;;  %v405_v34 = vsel %vm404_vm5, %v401_v23, %v400_v27 }
  0xb8   : > { %v441_v38 = vsel %vm404_vm5, %v438_v28, %v437_v33 }
  0xba   : > { %v461_v14 = vpop.xlane.xlu2 %460 }
  0xbb   : > { %v390_v16 = vpop.xlane.xlu0 %389  ;;  %v471_v18 = vperm.slane %v461_v14, %v399_v15 }
  0xbc   : > { %v402_v25 = vperm.slane %v390_v16, %v399_v15 }
  0xbd   : > { %v429_v19 = vpop.xlane.xlu1 %428  ;;  %v474_v26 = vsel %vm406_vm6, %v471_v18, %v473_v22 }
  0xbe   : > { %v439_v30 = vperm.slane %v429_v19, %v399_v15  ;;  %v407_v37 = vsel %vm406_vm6, %v402_v25, %v405_v34 }
  0xc0   : > { %v442_v42 = vsel %vm406_vm6, %v439_v30, %v441_v38 }
  0xc2   : > { %v464_v21 = vpop.xlane.xlu2 %463 }
  0xc3   : > { %v472_v24 = vperm.slane %v464_v21, %v399_v15  ;;  %v393_v31 = vpop.xlane.xlu0 %392 }
  0xc4   : > { %v403_v35 = vperm.slane %v393_v31, %v399_v15 }
  0xc5   : > { %v475_v29 = vsel %vm408_vm7, %v472_v24, %v474_v26  ;;  %v432_v36 = vpop.xlane.xlu1 %431 }
  0xc6   : > { %v477_v32 = vsel %vm411_vm8, %v475_v29, 0.0  ;;  %v440_v39 = vperm.slane %v432_v36, %v399_v15  ;;  %v409_v40 = vsel %vm408_vm7, %v403_v35, %v407_v37 }
  0xc7   : > { %478 = vadd.xlane.f32.xlu2 %v477_v32  ;;  %v412_v41 = vsel %vm411_vm8, %v409_v40, 0.0 }
  0xc8   : > { %413 = vadd.xlane.f32.xlu0 %v412_v41  ;;  %v443_v43 = vsel %vm408_vm7, %v440_v39, %v442_v42 }
  0xc9   : > { %v445_v44 = vsel %vm411_vm8, %v443_v43, 0.0 }
  0xca   : > { %446 = vadd.xlane.f32.xlu1 %v445_v44 }
 0x13a   : > { %v479_v45 = vpop.xlane.xlu2 %478 }
 0x13b   : > { %480 = vst.msk [vmem:[%s291_s12] sm:$0xf] %vm415_vm9, %v479_v45  ;;  %v414_v46 = vpop.xlane.xlu0 %413 }
 0x13c   : > { %416 = vst.msk [vmem:[%s283_s15] sm:$0xf] %vm415_vm9, %v414_v46 }
 0x13d   : > { %v447_v47 = vpop.xlane.xlu1 %446 }
 0x13e   : > { %448 = vst.msk [vmem:[%s287_s24] sm:$0xf] %vm415_vm9, %v447_v47 }
 0x13f PF: > { %s21_s20 = sadd.s32 1, %s834_s20   ;;  %s1018_s15 = smov %s818_s16 }
 0x140   : > { %p18_p0 = scmp.ge.s32.totalorder %s21_s20, 4   ;;  %s1019_s16 = smov %s822_s17 }
 0x141   : > { %s1020_s17 = smov %s913_s27  ;;  %s1021_s18 = smov %s830_s19 }
 0x142   : > { %s1022_s19 = smov %s1024_s22  ;;  %20 = sbr.rel (!%p18_p0) target bundleno = 6 (0x6), region = 113 }
 0x147   :  { %528 = vsyncpa [#allocation6], 1 }
 0x148   :  { %530 = vsyncpa [#allocation6 + $0x1], 1 }
 0x149   :  { %531 = vsyncpa [#allocation8], 1 }
 0x14a   :  { %533 = vsyncpa [#allocation8 + $0x1], 1 }

</bundles_post_ra>
